<compile_context>
chip_gen: v6e
topology: v6e:2x2x1
jax: 0.10.0
libtpu: 0.0.40
codegen_flags: <defaults>
</compile_context>

<pallas_src>
import functools

import jax
import jax.numpy as jnp
from jax.experimental import pallas as pl
from jax.experimental.pallas import tpu as pltpu


def _concat_critic_kernel(px_ref, py_ref, w2_ref, b2_ref, w3_ref, b3_ref,
                          out_ref, *, compute_dtype):
    ta = px_ref.shape[0]
    tb = py_ref.shape[0]
    h = px_ref.shape[1]

    # Layer 1: pre-activations were precomputed outside as px = x@W1x + b1,
    # py = y@W1y.  h1[a, b, :] = relu(px[a] + py[b]).
    h1 = jnp.maximum(px_ref[...][:, None, :] + py_ref[...][None, :, :], 0.0)

    # Layer 2 on the MXU over the collapsed pair axis (lane dim h preserved,
    # so the reshape is a free major-dim collapse).
    h1_2d = h1.reshape(ta * tb, h).astype(compute_dtype)
    w2 = w2_ref[...].astype(compute_dtype)
    h2 = jnp.dot(h1_2d, w2, preferred_element_type=jnp.float32) + b2_ref[...]
    h2 = jnp.maximum(h2, 0.0)

    # Layer 3: N=1 output -> VPU multiply + XLU lane reduce (MXU stays free).
    h2_3d = h2.reshape(ta, tb, h)
    scores = jnp.sum(h2_3d * w3_ref[...][None, :, :], axis=-1) + b3_ref[0, 0]
    out_ref[...] = scores.astype(out_ref.dtype)


def _pick_tile(n, target, align):
    """Largest tile <= target that is align-granular and divides n (else n)."""
    if n <= target:
        return n
    t = (target // align) * align
    while t >= align:
        if n % t == 0:
            return t
        t -= align
    return n


def concat_critic_forward(x, y, params, *, tile_a=128, tile_b=128,
                          compute_dtype=jnp.float32, vmem_limit_bytes=None):
    """out[a, b] = MLP(concat(x[a], y[b])) — exact ConcatCritic.forward."""
    w1, b1, w2, b2, w3, b3 = params
    bsz, x_dim = x.shape
    hidden = w2.shape[0]

    # Split W1 so the [B*B, d] pair matrix is never built: layer-1 becomes an
    # outer sum of two [B, h] factors (bias folded into px).
    w1x, w1y = w1[:x_dim], w1[x_dim:]
    px = (x @ w1x + b1).astype(jnp.float32)            # [B, h]
    py = (y @ w1y).astype(jnp.float32)                 # [B, h]
    w3_row = jnp.reshape(jnp.transpose(w3), (1, hidden)).astype(jnp.float32)
    b3_s = jnp.reshape(b3, (1, 1)).astype(jnp.float32)  # scalar -> SMEM

    ta = _pick_tile(bsz, tile_a, 8)     # a-block rows (sublane axis)
    tb = _pick_tile(bsz, tile_b, 128)   # b-block cols (lane-dense output)
    grid = (bsz // ta, bsz // tb)

    kernel = functools.partial(_concat_critic_kernel,
                               compute_dtype=compute_dtype)

    return pl.pallas_call(
        kernel,
        out_shape=jax.ShapeDtypeStruct((bsz, bsz), jnp.float32),
        grid=grid,
        in_specs=[
            pl.BlockSpec((ta, hidden), lambda ia, ib: (ia, 0)),      # px
            pl.BlockSpec((tb, hidden), lambda ia, ib: (ib, 0)),      # py
            pl.BlockSpec((hidden, hidden), lambda ia, ib: (0, 0)),   # W2 (resident)
            pl.BlockSpec((1, hidden), lambda ia, ib: (0, 0)),        # b2 (resident)
            pl.BlockSpec((1, hidden), lambda ia, ib: (0, 0)),        # w3 row (resident)
            pl.BlockSpec(memory_space=pltpu.MemorySpace.SMEM),       # b3 scalar
        ],
        out_specs=pl.BlockSpec((ta, tb), lambda ia, ib: (ia, ib)),
        compiler_params=pltpu.CompilerParams(
            dimension_semantics=("parallel", "parallel"),
            vmem_limit_bytes=vmem_limit_bytes,
        ),
    )(px, py, w2, b2, w3_row, b3_s)


def init_params(key, x_dim, y_dim, hidden_dim):
    """Deterministic init matching nn.Linear shapes (weights stored as [in, out])."""
    d = x_dim + y_dim
    keys = jax.random.split(key, 6)

    def linear(kw, kb, fan_in, fan_out):
        bound = 1.0 / jnp.sqrt(fan_in)
        w = jax.random.uniform(kw, (fan_in, fan_out), jnp.float32, -bound, bound)
        b = jax.random.uniform(kb, (1, fan_out), jnp.float32, -bound, bound)
        return w, b

    w1, b1 = linear(keys[0], keys[1], d, hidden_dim)
    w2, b2 = linear(keys[2], keys[3], hidden_dim, hidden_dim)
    w3, b3 = linear(keys[4], keys[5], hidden_dim, 1)
    return (w1, b1, w2, b2, w3, b3)


def _reference(x, y, params):
    """Pure-JAX replica of the PyTorch tile/concat/reshape/transpose forward."""
    w1, b1, w2, b2, w3, b3 = params
    b = x.shape[0]
    x_t = jnp.tile(x[None, :], (b, 1, 1))
    y_t = jnp.tile(y[:, None], (1, b, 1))
    xy = jnp.reshape(jnp.concatenate((x_t, y_t), axis=2), (b * b, -1))
    h = jnp.maximum(xy @ w1 + b1, 0.0)
    h = jnp.maximum(h @ w2 + b2, 0.0)
    s = h @ w3 + b3
    return jnp.transpose(jnp.reshape(s, (b, b)), (1, 0))


if __name__ == "__main__":
    key = jax.random.PRNGKey(0)
    k_x, k_y, k_p = jax.random.split(key, 3)

    # Small, MXU/lane-aligned config (hidden = 128 per perf review).
    B, X_DIM, Y_DIM, HIDDEN = 8, 16, 16, 128

    x = jax.random.normal(k_x, (B, X_DIM), jnp.float32)
    y = jax.random.normal(k_y, (B, Y_DIM), jnp.float32)
    params = init_params(k_p, X_DIM, Y_DIM, HIDDEN)

    ref = _reference(x, y, params)

    # f32 path (exact match to the reference MLP).
    out = jax.block_until_ready(concat_critic_forward(x, y, params))
    assert out.shape == (B, B)
    assert jnp.allclose(out, ref, atol=1e-4, rtol=1e-4)

    # bf16 MXU path (production option): same semantics, looser tolerance.
    out_bf16 = jax.block_until_ready(
        concat_critic_forward(x, y, params, compute_dtype=jnp.bfloat16))
    assert jnp.allclose(out_bf16, ref, atol=1e-1, rtol=1e-1)

    # Larger batch exercising the 2-D pipelined grid (multiple tiles per axis).
    B2 = 256
    x2 = jax.random.normal(jax.random.PRNGKey(1), (B2, X_DIM), jnp.float32)
    y2 = jax.random.normal(jax.random.PRNGKey(2), (B2, Y_DIM), jnp.float32)
    out2 = jax.block_until_ready(
        concat_critic_forward(x2, y2, params, tile_a=64, tile_b=128))
    ref2 = _reference(x2, y2, params)
    assert out2.shape == (B2, B2)
    assert jnp.allclose(out2, ref2, atol=1e-3, rtol=1e-3)

    print("KERNEL_OK")
</pallas_src>

<mosaic_0001>
module attributes {stable_mosaic.version = 11 : i64} {
  func.func @_concat_critic_kernel(%arg0: i32, %arg1: i32, %arg2: memref<8x128xf32, #tpu.memory_space<vmem>>, %arg3: memref<8x128xf32, #tpu.memory_space<vmem>>, %arg4: memref<128x128xf32, #tpu.memory_space<vmem>>, %arg5: memref<1x128xf32, #tpu.memory_space<vmem>>, %arg6: memref<1x128xf32, #tpu.memory_space<vmem>>, %arg7: memref<1x1xf32, #tpu.memory_space<smem>>, %arg8: memref<8x8xf32, #tpu.memory_space<vmem>>) attributes {dimension_semantics = [#tpu.dimension_semantics<parallel>, #tpu.dimension_semantics<parallel>], iteration_bounds = array<i64: 1, 1>, scalar_prefetch = 0 : i64, scratch_operands = 0 : i64, tpu.core_type = #tpu.core_type<tc>, window_params = [{transform_indices = @transform_0, window_bounds = array<i64: 8, 128>}, {transform_indices = @transform_1, window_bounds = array<i64: 8, 128>}, {pipeline_mode = #tpu.pipeline_mode<synchronous>, transform_indices = @transform_2, window_bounds = array<i64: 128, 128>}, {pipeline_mode = #tpu.pipeline_mode<synchronous>, transform_indices = @transform_3, window_bounds = array<i64: 1, 128>}, {pipeline_mode = #tpu.pipeline_mode<synchronous>, transform_indices = @transform_4, window_bounds = array<i64: 1, 128>}, {transform_indices = @transform_5, window_bounds = array<i64: 1, 1>}, {transform_indices = @transform_6, window_bounds = array<i64: 8, 8>}]} {
    %c0 = arith.constant 0 : index
    %c0_0 = arith.constant 0 : index
    %0 = vector.load %arg2[%c0, %c0_0] : memref<8x128xf32, #tpu.memory_space<vmem>>, vector<8x128xf32>
    %1 = vector.shape_cast %0 : vector<8x128xf32> to vector<8x1x128xf32>
    %c0_1 = arith.constant 0 : index
    %c0_2 = arith.constant 0 : index
    %2 = vector.load %arg3[%c0_1, %c0_2] : memref<8x128xf32, #tpu.memory_space<vmem>>, vector<8x128xf32>
    %3 = vector.shape_cast %2 : vector<8x128xf32> to vector<1x8x128xf32>
    %4 = vector.broadcast %1 : vector<8x1x128xf32> to vector<8x8x128xf32>
    %5 = vector.broadcast %3 : vector<1x8x128xf32> to vector<8x8x128xf32>
    %6 = arith.addf %4, %5 : vector<8x8x128xf32>
    %cst = arith.constant 0.000000e+00 : f32
    %7 = vector.broadcast %cst : f32 to vector<8x8x128xf32>
    %8 = arith.maximumf %6, %7 : vector<8x8x128xf32>
    %9 = vector.shape_cast %8 : vector<8x8x128xf32> to vector<64x128xf32>
    %c0_3 = arith.constant 0 : index
    %c0_4 = arith.constant 0 : index
    %10 = vector.load %arg4[%c0_3, %c0_4] : memref<128x128xf32, #tpu.memory_space<vmem>>, vector<128x128xf32>
    %cst_5 = arith.constant dense<0.000000e+00> : vector<64x128xf32>
    %11 = tpu.matmul %9, %10, %cst_5 {dimension_numbers = #tpu.dot_dimension_numbers<[1], [0], [0], [1], [0, 0, 1, 1], [], []>} : vector<64x128xf32>, vector<128x128xf32>, vector<64x128xf32> -> vector<64x128xf32>
    %c0_6 = arith.constant 0 : index
    %c0_7 = arith.constant 0 : index
    %12 = vector.load %arg5[%c0_6, %c0_7] : memref<1x128xf32, #tpu.memory_space<vmem>>, vector<1x128xf32>
    %13 = vector.broadcast %12 : vector<1x128xf32> to vector<64x128xf32>
    %14 = arith.addf %11, %13 : vector<64x128xf32>
    %cst_8 = arith.constant 0.000000e+00 : f32
    %15 = vector.broadcast %cst_8 : f32 to vector<64x128xf32>
    %16 = arith.maximumf %14, %15 : vector<64x128xf32>
    %17 = vector.shape_cast %16 : vector<64x128xf32> to vector<8x8x128xf32>
    %c0_9 = arith.constant 0 : index
    %c0_10 = arith.constant 0 : index
    %18 = vector.load %arg6[%c0_9, %c0_10] : memref<1x128xf32, #tpu.memory_space<vmem>>, vector<1x128xf32>
    %19 = vector.shape_cast %18 : vector<1x128xf32> to vector<1x1x128xf32>
    %20 = vector.broadcast %19 : vector<1x1x128xf32> to vector<8x8x128xf32>
    %21 = arith.mulf %17, %20 : vector<8x8x128xf32>
    %cst_11 = arith.constant dense<0.000000e+00> : vector<8x8xf32>
    %22 = vector.multi_reduction <add>, %21, %cst_11 [2] : vector<8x8x128xf32> to vector<8x8xf32>
    %c0_12 = arith.constant 0 : index
    %c0_13 = arith.constant 0 : index
    %23 = memref.load %arg7[%c0_12, %c0_13] : memref<1x1xf32, #tpu.memory_space<smem>>
    %24 = vector.broadcast %23 : f32 to vector<8x8xf32>
    %25 = arith.addf %22, %24 : vector<8x8xf32>
    %c0_14 = arith.constant 0 : index
    %c0_15 = arith.constant 0 : index
    %26 = vector.load %arg8[%c0_14, %c0_15] : memref<8x8xf32, #tpu.memory_space<vmem>>, vector<8x8xf32>
    tpu.vector_store %arg8[%c0_14, %c0_15], %25 {strides = array<i32>} : memref<8x8xf32, #tpu.memory_space<vmem>>, vector<8x8xf32>,
    return
  }
  func.func @transform_0(%arg0: i32, %arg1: i32) -> (i32, i32) {
    %c0_i32 = arith.constant 0 : i32
    %c0_i32_0 = arith.constant 0 : i32
    return %arg0, %c0_i32 : i32, i32
  }
  func.func @transform_1(%arg0: i32, %arg1: i32) -> (i32, i32) {
    %c0_i32 = arith.constant 0 : i32
    %c0_i32_0 = arith.constant 0 : i32
    return %arg1, %c0_i32 : i32, i32
  }
  func.func @transform_2(%arg0: i32, %arg1: i32) -> (i32, i32) {
    %c0_i32 = arith.constant 0 : i32
    %c0_i32_0 = arith.constant 0 : i32
    %c0_i32_1 = arith.constant 0 : i32
    return %c0_i32, %c0_i32_0 : i32, i32
  }
  func.func @transform_3(%arg0: i32, %arg1: i32) -> (i32, i32) {
    %c0_i32 = arith.constant 0 : i32
    %c0_i32_0 = arith.constant 0 : i32
    %c0_i32_1 = arith.constant 0 : i32
    return %c0_i32, %c0_i32_0 : i32, i32
  }
  func.func @transform_4(%arg0: i32, %arg1: i32) -> (i32, i32) {
    %c0_i32 = arith.constant 0 : i32
    %c0_i32_0 = arith.constant 0 : i32
    %c0_i32_1 = arith.constant 0 : i32
    return %c0_i32, %c0_i32_0 : i32, i32
  }
  func.func @transform_5(%arg0: i32, %arg1: i32) -> (i32, i32) {
    %c0_i32 = arith.constant 0 : i32
    %c0_i32_0 = arith.constant 0 : i32
    %c0_i32_1 = arith.constant 0 : i32
    return %c0_i32, %c0_i32_0 : i32, i32
  }
  func.func @transform_6(%arg0: i32, %arg1: i32) -> (i32, i32) {
    %c0_i32 = arith.constant 0 : i32
    return %arg0, %arg1 : i32, i32
  }
}

</mosaic_0001>

<bundles_post_ra>
// kernel: tpu_custom_call.1
= control target key start
LH: loop header
LB: loop body
LE: loop exit
PB: predicated region body
PF: predicated region fallthrough
CT: control target
= control target key end

     0   :  { %12 = vsyncpa [#allocation4], 0  ;;  %s711_s0 = inlined_call_operand.hbm [shape: f32[8,128], index: 0, kind: input, shape index: {}]   ;;  %s712_s1 = inlined_call_operand.hbm [shape: f32[8,128], index: 1, kind: input, shape index: {}]   ;;  %s713_s2 = inlined_call_operand.hbm [shape: f32[128,128], index: 2, kind: input, shape index: {}]   ;;  %s714_s3 = inlined_call_operand.vmem [shape: f32[1,128], index: 3, kind: input, shape index: {}]   ;;  %s715_s4 = inlined_call_operand.vmem [shape: f32[1,128], index: 4, kind: input, shape index: {}]   ;;  %s716_s5 = inlined_call_operand.<no memory space> [shape: f32[1,1], index: 5, kind: input, shape index: {}]   ;;  %s717_s6 = inlined_call_operand.hbm [shape: f32[8,8], index: 6, kind: output, shape index: {}]  }
   0x1   :  { %13 = vsyncpa [#allocation7], 0 }
   0x2   :  { %14 = vsyncpa [#allocation5], 0  ;;  %s618_s21 = smov [#allocation6]   ;;  %s619_s23 = smov [#allocation3]  }
   0x3   :  { %s31_s22 = sshll.u32 %s618_s21, 4  ;;  %s21_s24 = sshll.u32 %s619_s23, 4  ;;  %s32_s22 = int_to_ptr.vmem [resolvable:$true] %s31_s22  ;;  %s22_s24 = int_to_ptr.vmem [resolvable:$true] %s21_s24 }
   0x4   :  { %s540_s25 = scalar_lea.vmem %s32_s22, 128  ;;  %p545_p1 = scmp.lt.s32.totalorder %s32_s22, %s32_s22 }
   0x5   :  { %p541_p0 = scmp.ne.s32.totalorder %s32_s22, %s540_s25  ;;  %p546_p2 = scmp.lt.s32.totalorder %s540_s25, %s540_s25 }
   0x7   :  { %p547_p3 = por %p546_p2, %p545_p1 }
   0x9   :  { %p548_p4 = pnand %p547_p3, %p541_p0 }
   0xb   :  { %551 = shalt.err (!%p548_p4)
}
   0xc   :  { %34 = dma.hbm_to_vmem [thread:$0]  %s712_s1, 128, %s32_s22, [#allocation7]  }
   0xd   :  { %s560_s28 = scalar_lea.vmem %s22_s24, 128  ;;  %p565_p6 = scmp.lt.s32.totalorder %s22_s24, %s22_s24 }
   0xe   :  { %p561_p5 = scmp.ne.s32.totalorder %s22_s24, %s560_s28  ;;  %p566_p7 = scmp.lt.s32.totalorder %s560_s28, %s560_s28 }
  0x10   :  { %p567_p8 = por %p566_p7, %p565_p6 }
  0x12   :  { %p568_p9 = pnand %p567_p8, %p561_p5 }
  0x14   :  { %571 = shalt.err (!%p568_p9)
}
  0x15   :  { %24 = dma.hbm_to_vmem [thread:$0]  %s711_s0, 128, %s22_s24, [#allocation4]  }
  0x16   :  { %s620_s7 = smov [#allocation8]  }
  0x17   :  { %s40_s8 = sshll.u32 %s620_s7, 4  ;;  %s41_s8 = int_to_ptr.vmem [resolvable:$true] %s40_s8 }
  0x18   :  { %s580_s9 = scalar_lea.vmem %s41_s8, 2048  ;;  %p585_p11 = scmp.lt.s32.totalorder %s41_s8, %s41_s8 }
  0x19   :  { %p581_p10 = scmp.ne.s32.totalorder %s41_s8, %s580_s9  ;;  %p586_p12 = scmp.lt.s32.totalorder %s580_s9, %s580_s9 }
  0x1b   :  { %p587_p13 = por %p586_p12, %p585_p11 }
  0x1d   :  { %p588_p0 = pnand %p587_p13, %p581_p10 }
  0x1f   :  { %591 = shalt.err (!%p588_p0)
}
  0x20   :  { %s621_s1 = smov 128   ;;  %s622_s10 = smov 8  }
  0x21   :  { %46 = dma.hbm_to_vmem [thread:$0]  %s713_s2, 2048, %s41_s8, [#allocation7], %s621_s1, %s621_s1, %s622_s10  }
  0x22   :  { %612 = dma.done.wait [#allocation4], 128  }
  0x23   :  { %613 = vsyncadd [#allocation4], 4294967168 }
  0x24   :  { %614 = dma.done.wait [#allocation7], 2176  }
  0x25   :  { %615 = vsyncadd [#allocation7], 4294965120  ;;  %v68_v0 = vlaneseq  ;;  %v623_v1 = vmov 1966171168   ;;  %v185_v7 = vld [vmem:[#allocation8 + $0x78] sm:$0xff]  ;;  %v184_v8 = vld [vmem:[#allocation8 + $0x70] sm:$0xff] }
  0x26   :  { %v66_v2 = vunpack.c.l.s4 %v623_v1  ;;  %448 = vmatprep.subr.mxu0 %v185_v7  ;;  %492 = vmatprep.subr.mxu1 %v185_v7  ;;  %v183_v9 = vld [vmem:[#allocation8 + $0x68] sm:$0xff]  ;;  %v182_v11 = vld [vmem:[#allocation8 + $0x60] sm:$0xff]  ;;  %v62_v12 = vld [vmem:[#allocation3] sm:$0xff]  ;;  %vm389_vm0 = vcmask 1041409   ;;  %vm391_vm1 = vcmask 1042434   ;;  %vm393_vm2 = vcmask 1043459  }
  0x27   :  { %v69_v3 = vshrl.u32 %v68_v0, 7  ;;  %v356_v4 = vand.u32 127, %v68_v0  ;;  %449 = vmatpush3.msra.mxu0 %v185_v7  ;;  %508 = vmatpush3.msra.mxu1 %v185_v7  ;;  %v181_v13 = vld [vmem:[#allocation8 + $0x58] sm:$0xff]  ;;  %v64_v15 = vcombine.high %v62_v12, %v62_v12  ;;  %v180_v16 = vld [vmem:[#allocation8 + $0x50] sm:$0xff]  ;;  %v179_v17 = vld [vmem:[#allocation8 + $0x48] sm:$0xff]  ;;  %vm395_vm3 = vcmask 1044484  }
  0x28   :  { %v67_v6 = vunpack.c.0.s8 %v66_v2  ;;  %450 = vmatprep.subr.mxu0 %v184_v8  ;;  %493 = vmatprep.subr.mxu1 %v184_v8  ;;  %v178_v21 = vld [vmem:[#allocation8 + $0x40] sm:$0xff]  ;;  %v177_v23 = vld [vmem:[#allocation8 + $0x38] sm:$0xff]  ;;  %v176_v27 = vld [vmem:[#allocation8 + $0x30] sm:$0xff]  ;;  %vm397_vm4 = vcmask 1045509   ;;  %vm399_vm5 = vcmask 1046534   ;;  %vm401_vm6 = vcmask 1047559  }
  0x29   :  { %v669_v5 = vsub.s32 %v356_v4, %v69_v3  ;;  %451 = vmatpush3.msra.mxu0 %v184_v8  ;;  %509 = vmatpush3.msra.mxu1 %v184_v8  ;;  %v671_v19 = vsub.s32 0, %v69_v3  ;;  %v674_v25 = vld [vmem:[#allocation6] sm:$0xff]  ;;  %v175_v29 = vld [vmem:[#allocation8 + $0x28] sm:$0xff]  ;;  %v174_v34 = vld [vmem:[#allocation8 + $0x20] sm:$0xff]  ;;  %vm404_vm7 = vcmask 64512  }
  0x2a   :  { %v70_v10 = vsub.s32 %v67_v6, %v69_v3  ;;  %452 = vmatprep.subr.mxu0 %v183_v9  ;;  %494 = vmatprep.subr.mxu1 %v183_v9  ;;  %v173_v38 = vld [vmem:[#allocation8 + $0x18] sm:$0xff]  ;;  %v172_v44 = vld [vmem:[#allocation8 + $0x10] sm:$0xff]  ;;  %v171_v48 = vld [vmem:[#allocation8 + $0x8] sm:$0xff] }
  0x2b   :  { %453 = vmatpush3.msra.mxu0 %v183_v9  ;;  %510 = vmatpush3.msra.mxu1 %v183_v9  ;;  %v170_v53 = vld [vmem:[#allocation8] sm:$0xff]  ;;  %v422_v0 = vld [vmem:[%s714_s3] ss:$0 sm:$0xff] }
  0x2c   :  { %v71_v14 = vrot.slane %v62_v12, %v70_v10  ;;  %454 = vmatprep.subr.mxu0 %v182_v11  ;;  %495 = vmatprep.subr.mxu1 %v182_v11  ;;  %v78_v20 = vrot.slane %v64_v15, %v70_v10  ;;  %v423_v4 = vld [vmem:[%s715_s4] ss:$0 sm:$0xff] }
  0x2d   :  { %455 = vmatpush3.msra.mxu0 %v182_v11  ;;  %511 = vmatpush3.msra.mxu1 %v182_v11 }
  0x2e   :  { %456 = vmatprep.subr.mxu0 %v181_v13  ;;  %496 = vmatprep.subr.mxu1 %v181_v13  ;;  %v87_v18 = vrot.slane %v71_v14, %v70_v10  ;;  %v79_v22 = vcombine.high %v71_v14, %v71_v14  ;;  %v80_v26 = vcombine.high %v78_v20, %v78_v20 }
  0x2f   :  { %457 = vmatpush3.msra.mxu0 %v181_v13  ;;  %512 = vmatpush3.msra.mxu1 %v181_v13  ;;  %v94_v32 = vrot.slane %v78_v20, %v70_v10 }
  0x30   :  { %458 = vmatprep.subr.mxu0 %v180_v16  ;;  %497 = vmatprep.subr.mxu1 %v180_v16  ;;  %v117_v24 = vrot.slane %v87_v18, %v671_v19  ;;  %v101_v28 = vrot.slane %v79_v22, %v70_v10  ;;  %v109_v30 = vcombine.high %v87_v18, %v87_v18 }
  0x31   :  { %459 = vmatpush3.msra.mxu0 %v180_v16  ;;  %513 = vmatpush3.msra.mxu1 %v180_v16  ;;  %v108_v33 = vrot.slane %v80_v26, %v70_v10  ;;  %v110_v35 = vcombine.high %v94_v32, %v94_v32  ;;  %v133_v41 = vrot.slane %v94_v32, %v671_v19 }
  0x32   :  { %460 = vmatprep.subr.mxu0 %v179_v17  ;;  %498 = vmatprep.subr.mxu1 %v179_v17  ;;  %v154_v31 = vadd.f32 %v117_v24, %v674_v25  ;;  %v121_v36 = vrot.slane %v101_v28, %v671_v19  ;;  %v111_v37 = vcombine.high %v101_v28, %v101_v28 }
  0x33   :  { %461 = vmatpush3.msra.mxu0 %v179_v17  ;;  %514 = vmatpush3.msra.mxu1 %v179_v17  ;;  %v125_v40 = vrot.slane %v109_v30, %v671_v19  ;;  %v137_v42 = vrot.slane %v108_v33, %v671_v19  ;;  %v112_v43 = vcombine.high %v108_v33, %v108_v33 }
  0x34   :  { %462 = vmatprep.subr.mxu0 %v178_v21  ;;  %499 = vmatprep.subr.mxu1 %v178_v21  ;;  %v162_v39 = vmax.f32 %v154_v31, 0.0  ;;  %v141_v45 = vrot.slane %v110_v35, %v671_v19  ;;  %v155_v46 = vadd.f32 %v121_v36, %v674_v25  ;;  %v129_v47 = vrot.slane %v111_v37, %v671_v19 }
  0x35   :  { %463 = vmatpush3.msra.mxu0 %v178_v21  ;;  %515 = vmatpush3.msra.mxu1 %v178_v21  ;;  %v156_v49 = vadd.f32 %v125_v40, %v674_v25  ;;  %v158_v50 = vadd.f32 %v133_v41, %v674_v25  ;;  %v159_v51 = vadd.f32 %v137_v42, %v674_v25  ;;  %v338_v36 = vstv %s716_s5  ;;  %s624_s5 = smov [#allocation9]  }
  0x36   :  { %464 = vmatprep.subr.mxu0 %v177_v23  ;;  %500 = vmatprep.subr.mxu1 %v177_v23  ;;  %v145_v52 = vrot.slane %v112_v43, %v671_v19  ;;  %v160_v54 = vadd.f32 %v141_v45, %v674_v25  ;;  %v163_v55 = vmax.f32 %v155_v46, 0.0  ;;  %v157_v56 = vadd.f32 %v129_v47, %v674_v25  ;;  %s412_s15 = sshll.u32 %s624_s5, 4  ;;  %s413_s15 = int_to_ptr.vmem [resolvable:$true] %s412_s15 }
  0x37   :  { %465 = vmatpush3.msra.mxu0 %v177_v23  ;;  %516 = vmatpush3.msra.mxu1 %v177_v23  ;;  %v164_v57 = vmax.f32 %v156_v49, 0.0  ;;  %v166_v58 = vmax.f32 %v158_v50, 0.0  ;;  %v167_v59 = vmax.f32 %v159_v51, 0.0  ;;  %s592_s16 = scalar_lea.vmem %s413_s15, 128  ;;  %p597_p2 = scmp.lt.s32.totalorder %s413_s15, %s413_s15 }
  0x38   :  { %466 = vmatprep.subr.mxu0 %v176_v27  ;;  %501 = vmatprep.subr.mxu1 %v176_v27  ;;  %v161_v60 = vadd.f32 %v145_v52, %v674_v25  ;;  %v168_v61 = vmax.f32 %v160_v54, 0.0  ;;  %v165_v62 = vmax.f32 %v157_v56, 0.0  ;;  %p593_p1 = scmp.ne.s32.totalorder %s413_s15, %s592_s16  ;;  %p598_p3 = scmp.lt.s32.totalorder %s592_s16, %s592_s16 }
  0x39   :  { %467 = vmatpush3.msra.mxu0 %v176_v27  ;;  %517 = vmatpush3.msra.mxu1 %v176_v27 }
  0x3a   :  { %468 = vmatprep.subr.mxu0 %v175_v29  ;;  %502 = vmatprep.subr.mxu1 %v175_v29  ;;  %v169_v63 = vmax.f32 %v161_v60, 0.0  ;;  %p599_p4 = por %p598_p3, %p597_p2 }
  0x3b   :  { %469 = vmatpush3.msra.mxu0 %v175_v29  ;;  %518 = vmatpush3.msra.mxu1 %v175_v29 }
  0x3c   :  { %470 = vmatprep.subr.mxu0 %v174_v34  ;;  %503 = vmatprep.subr.mxu1 %v174_v34  ;;  %p600_p5 = pnand %p599_p4, %p593_p1 }
  0x3d   :  { %471 = vmatpush3.msra.mxu0 %v174_v34  ;;  %519 = vmatpush3.msra.mxu1 %v174_v34 }
  0x3e   :  { %472 = vmatprep.subr.mxu0 %v173_v38  ;;  %504 = vmatprep.subr.mxu1 %v173_v38 }
  0x3f   :  { %473 = vmatpush3.msra.mxu0 %v173_v38  ;;  %480 = vmatprep.mubr.f32.mxu0 %v162_v39 }
  0x40   :  { %474 = vmatprep.subr.mxu0 %v172_v44  ;;  %520 = vmatpush3.msra.mxu1 %v173_v38 }
  0x41   :  { %475 = vmatpush3.msra.mxu0 %v172_v44  ;;  %505 = vmatprep.subr.mxu1 %v172_v44 }
  0x42   :  { %476 = vmatprep.subr.mxu0 %v171_v48  ;;  %521 = vmatpush3.msra.mxu1 %v172_v44 }
  0x43   :  { %477 = vmatpush3.msra.mxu0 %v171_v48  ;;  %506 = vmatprep.subr.mxu1 %v171_v48 }
  0x44   :  { %478 = vmatprep.subr.mxu0 %v170_v53  ;;  %522 = vmatpush3.msra.mxu1 %v171_v48 }
  0x45   :  { %479 = vmatpush3.msra.mxu0 %v170_v53  ;;  %507 = vmatprep.subr.mxu1 %v170_v53 }
  0x46   :  { %481 = vmatmul.mubr.f32.vlgmr.msra.gmra.mxu0 %v163_v55  ;;  %523 = vmatpush3.msra.mxu1 %v170_v53 }
  0x47   :  { %483 = vmatprep.mubr.f32.mxu0 %v164_v57  ;;  %486 = vmatprep.mubr.f32.mxu1 %v166_v58 }
  0x48   :  { %487 = vmatmul.mubr.f32.vlgmr.msra.gmra.mxu1 %v167_v59 }
  0x49   :  { %489 = vmatprep.mubr.f32.mxu1 %v168_v61 }
  0x4a   :  { %484 = vmatmul.mubr.f32.gmra.mxu0 %v165_v62 }
  0x4c   :  { %490 = vmatmul.mubr.f32.gmra.mxu1 %v169_v63 }
 0x106   :  { %v482_v1 = vpop.f32.mrf.mxu0 }
 0x107   :  { %v265_v2 = vadd.f32 %v482_v1, %v422_v0 }
 0x108   :  { %v259_v3 = vpop.f32.mrf.mxu0  ;;  %v488_v6 = vpop.f32.mrf.mxu1 }
 0x109   :  { %v299_v7 = vmax.f32 %v265_v2, 0.0  ;;  %v260_v8 = vadd.f32 %v422_v0, %v259_v3  ;;  %v285_v19 = vadd.f32 %v488_v6, %v422_v0 }
 0x10a   :  { %v485_v9 = vpop.f32.mrf.mxu0  ;;  %v279_v10 = vpop.f32.mrf.mxu1 }
 0x10b   :  { %v298_v11 = vmax.f32 %v260_v8, 0.0  ;;  %v275_v12 = vadd.f32 %v485_v9, %v422_v0  ;;  %v314_v13 = vmul.f32 %v423_v4, %v299_v7  ;;  %v280_v15 = vadd.f32 %v422_v0, %v279_v10 }
 0x10c   :  { %v269_v14 = vpop.f32.mrf.mxu0  ;;  %v491_v16 = vpop.f32.mrf.mxu1  ;;  %v303_v28 = vmax.f32 %v285_v19, 0.0 }
 0x10d   :  { %v301_v17 = vmax.f32 %v275_v12, 0.0  ;;  %v270_v18 = vadd.f32 %v422_v0, %v269_v14  ;;  %323 = vadd.xlane.f32.xlu0 %v314_v13  ;;  %v302_v20 = vmax.f32 %v280_v15, 0.0  ;;  %v313_v23 = vmul.f32 %v423_v4, %v298_v11 }
 0x10e   :  { %v289_v21 = vpop.f32.mrf.mxu1  ;;  %v295_v29 = vadd.f32 %v491_v16, %v422_v0  ;;  %v318_v33 = vmul.f32 %v423_v4, %v303_v28 }
 0x10f   :  { %v300_v22 = vmax.f32 %v270_v18, 0.0  ;;  %v316_v24 = vmul.f32 %v423_v4, %v301_v17  ;;  %v290_v25 = vadd.f32 %v422_v0, %v289_v21  ;;  %v317_v27 = vmul.f32 %v423_v4, %v302_v20 }
 0x110   :  { %v305_v32 = vmax.f32 %v295_v29, 0.0 }
 0x111   :  { %321 = vadd.xlane.f32.xlu0 %v313_v23  ;;  %327 = vadd.xlane.f32.xlu1 %v316_v24  ;;  %v304_v26 = vmax.f32 %v290_v25, 0.0  ;;  %v315_v30 = vmul.f32 %v423_v4, %v300_v22 }
 0x112   :  { %v320_v34 = vmul.f32 %v423_v4, %v305_v32 }
 0x113   :  { %v319_v31 = vmul.f32 %v423_v4, %v304_v26 }
 0x115   :  { %325 = vadd.xlane.f32.xlu1 %v315_v30  ;;  %329 = vadd.xlane.f32.xlu0 %v317_v27 }
 0x119   :  { %331 = vadd.xlane.f32.xlu1 %v318_v33  ;;  %333 = vadd.xlane.f32.xlu0 %v319_v31 }
 0x11d   :  { %335 = vadd.xlane.f32.xlu1 %v320_v34 }
 0x196   :  { %v324_v35 = vpop.xlane.xlu0 %323 }
 0x197   :  { %v340_v40 = vadd.f32 %v338_v36, %v324_v35 }
 0x199   :  { %v364_v47 = vrot.slane %v340_v40, %v669_v5 }
 0x19a   :  { %v322_v37 = vpop.xlane.xlu0 %321  ;;  %v328_v38 = vpop.xlane.xlu1 %327 }
 0x19b   :  { %v339_v39 = vadd.f32 %v338_v36, %v322_v37  ;;  %v342_v42 = vadd.f32 %v338_v36, %v328_v38 }
 0x19d   :  { %v360_v41 = vrot.slane %v339_v39, %v669_v5  ;;  %v372_v51 = vrot.slane %v342_v42, %v669_v5 }
 0x19e   :  { %v326_v43 = vpop.xlane.xlu1 %325  ;;  %v330_v44 = vpop.xlane.xlu0 %329 }
 0x19f   :  { %v341_v45 = vadd.f32 %v338_v36, %v326_v43  ;;  %v343_v46 = vadd.f32 %v338_v36, %v330_v44  ;;  %v390_v50 = vsel %vm389_vm0, %v364_v47, %v360_v41 }
 0x1a1   :  { %v368_v48 = vrot.slane %v341_v45, %v669_v5  ;;  %v376_v49 = vrot.slane %v343_v46, %v669_v5 }
 0x1a2   :  { %v332_v52 = vpop.xlane.xlu1 %331  ;;  %v334_v53 = vpop.xlane.xlu0 %333 }
 0x1a3   :  { %v392_v54 = vsel %vm391_vm1, %v368_v48, %v390_v50  ;;  %v344_v55 = vadd.f32 %v338_v36, %v332_v52  ;;  %v345_v56 = vadd.f32 %v338_v36, %v334_v53 }
 0x1a4   :  { %v394_v57 = vsel %vm393_vm2, %v372_v51, %v392_v54 }
 0x1a5   :  { %v396_v58 = vsel %vm395_vm3, %v376_v49, %v394_v57  ;;  %v380_v59 = vrot.slane %v344_v55, %v669_v5  ;;  %v384_v60 = vrot.slane %v345_v56, %v669_v5 }
 0x1a6   :  { %v336_v61 = vpop.xlane.xlu1 %335 }
 0x1a7   :  { %v398_v62 = vsel %vm397_vm4, %v380_v59, %v396_v58  ;;  %v346_v63 = vadd.f32 %v338_v36, %v336_v61 }
 0x1a8   :  { %v400_v1 = vsel %vm399_vm5, %v384_v60, %v398_v62 }
 0x1a9   :  { %v388_v0 = vrot.slane %v346_v63, %v669_v5 }
 0x1ab   :  { %v402_v2 = vsel %vm401_vm6, %v388_v0, %v400_v1 }
 0x1ac   :  { %405 = vst.msk [vmem:[#allocation9] sm:$0xff] %vm404_vm7, %v402_v2 }
 0x1ad   :  { %603 = shalt.err (!%p600_p5)
}
 0x1ae   :  { %415 = dma.vmem_to_hbm [thread:$0]  %s413_s15, 128, %s717_s6, [#allocation5]  }
 0x1af   :  { %616 = dma.done.wait [#allocation5], 128  }
 0x1b0   :  { %617 = vsyncadd [#allocation5], 4294967168 }
 0x1b1   :  { %419 = vsyncpa [#allocation4], 1 }
 0x1b2   :  { %420 = vsyncpa [#allocation7], 1 }
 0x1b3   :  { %421 = vsyncpa [#allocation5], 1 }

</bundles_post_ra>
